<compile_context>
chip_gen: v5e
topology: v5e:2x2
jax: 0.10.0
libtpu: 0.0.40
codegen_flags: <defaults>
</compile_context>

<pallas_src>
import jax
import jax.numpy as jnp
from jax import lax
from jax.experimental import pallas as pl
from jax.experimental.pallas import tpu as pltpu


LN_EPS = 1e-12


def _img_embed_kernel(x_ref, add_ref,
                      w1_ref, b1_ref, w2_ref, b2_ref,
                      g_ref, bt_ref, o_ref):
    # x_ref:   (TQ, D)   image feature tile
    # add_ref: (TQ, H)   pos (+ per-token type, if any) embedding tile
    # w1_ref:  (D, H)    b1_ref: (1, H)
    # w2_ref:  (H, H)    b2_ref: (1, H)   (type row folded in when constant)
    # g_ref:   (1, H)    bt_ref: (1, H)   LayerNorm gamma / beta
    # o_ref:   (TQ, H)

    x = x_ref[...]

    # Linear -> Tanh -> Linear (MXU matmuls, f32 accumulate)
    h = jnp.tanh(
        jnp.dot(x, w1_ref[...], preferred_element_type=jnp.float32) + b1_ref[...]
    )
    y = jnp.dot(h, w2_ref[...], preferred_element_type=jnp.float32) + b2_ref[...]

    # Add positional (+ type) embeddings
    e = y + add_ref[...]

    # LayerNorm (biased variance + eps, matching torch.nn.LayerNorm)
    mean = jnp.mean(e, axis=-1, keepdims=True)
    xc = e - mean
    var = jnp.mean(xc * xc, axis=-1, keepdims=True)
    inv = lax.rsqrt(var + LN_EPS)

    # Dropout in eval mode is identity.
    o_ref[...] = ((xc * inv) * g_ref[...] + bt_ref[...]).astype(o_ref.dtype)


def _round_up(x, m):
    return ((x + m - 1) // m) * m


def image_embeddings(img_feat, pos_embs, type_embeddings,
                     w1, b1, w2, b2, gamma, beta, *, tq=256):
    """img_feat: (B, S, D); pos_embs / type_embeddings broadcastable to (B, S, H)."""
    B, S, D = img_feat.shape
    H = w1.shape[1]
    N = B * S

    out_dtype = img_feat.dtype

    # Token-tile size: multiple of 8 (sublane), no larger than padded N.
    tq = max(8, min(tq, _round_up(N, 8)))
    n_pad = _round_up(N, tq)

    x = img_feat.reshape(N, D).astype(jnp.float32)

    b2r = b2.reshape(1, H).astype(jnp.float32)
    if type_embeddings.size == H:
        # Constant row -> fold into the second linear's bias (no extra stream).
        b2r = b2r + type_embeddings.reshape(1, H).astype(jnp.float32)
        add = jnp.broadcast_to(pos_embs, (B, S, H)).reshape(N, H).astype(jnp.float32)
    else:
        # Per-token type embeddings: combine with positional embeddings so the
        # kernel still only streams one additive (N, H) tensor.
        add = (jnp.broadcast_to(pos_embs, (B, S, H)).astype(jnp.float32)
               + jnp.broadcast_to(type_embeddings, (B, S, H)).astype(jnp.float32)
               ).reshape(N, H)

    if n_pad != N:
        pad = n_pad - N
        x = jnp.pad(x, ((0, pad), (0, 0)))
        add = jnp.pad(add, ((0, pad), (0, 0)))

    b1r = b1.reshape(1, H).astype(jnp.float32)
    g2 = gamma.reshape(1, H).astype(jnp.float32)
    bt2 = beta.reshape(1, H).astype(jnp.float32)
    w1f = w1.astype(jnp.float32)
    w2f = w2.astype(jnp.float32)

    grid = (n_pad // tq,)

    out = pl.pallas_call(
        _img_embed_kernel,
        out_shape=jax.ShapeDtypeStruct((n_pad, H), out_dtype),
        grid_spec=pltpu.PrefetchScalarGridSpec(
            num_scalar_prefetch=0,
            grid=grid,
            in_specs=[
                pl.BlockSpec((tq, D), lambda i: (i, 0)),   # img_feat tile
                pl.BlockSpec((tq, H), lambda i: (i, 0)),   # pos(+type) tile
                pl.BlockSpec((D, H), lambda i: (0, 0)),    # W1 (VMEM-resident)
                pl.BlockSpec((1, H), lambda i: (0, 0)),    # b1
                pl.BlockSpec((H, H), lambda i: (0, 0)),    # W2
                pl.BlockSpec((1, H), lambda i: (0, 0)),    # b2 (+type row)
                pl.BlockSpec((1, H), lambda i: (0, 0)),    # gamma
                pl.BlockSpec((1, H), lambda i: (0, 0)),    # beta
            ],
            out_specs=pl.BlockSpec((tq, H), lambda i: (i, 0)),
        ),
        compiler_params=pltpu.CompilerParams(
            dimension_semantics=("parallel",)),
    )(x, add, w1f, b1r, w2f, b2r, g2, bt2)

    return out[:N].reshape(B, S, H)


def _reference(img_feat, pos_embs, type_embeddings, w1, b1, w2, b2, gamma, beta):
    h = jnp.tanh(img_feat @ w1 + b1)
    y = h @ w2 + b2
    e = y + type_embeddings + pos_embs
    mean = jnp.mean(e, axis=-1, keepdims=True)
    var = jnp.mean((e - mean) ** 2, axis=-1, keepdims=True)
    return (e - mean) / jnp.sqrt(var + LN_EPS) * gamma + beta


if __name__ == "__main__":
    # Small config consistent with the module: img_dim=256, hidden=128,
    # batch=2, seq=8 image regions.
    IMG_DIM, HIDDEN = 256, 128
    B, S = 2, 8

    key = jax.random.PRNGKey(0)
    k_x, k_p, k_t, k_w1, k_b1, k_w2, k_b2, k_g, k_bt = jax.random.split(key, 9)

    img_feat = jax.random.normal(k_x, (B, S, IMG_DIM), dtype=jnp.float32)
    pos_embs = 0.02 * jax.random.normal(k_p, (B, S, HIDDEN), dtype=jnp.float32)
    type_embeddings = 0.02 * jax.random.normal(k_t, (1, 1, HIDDEN), dtype=jnp.float32)

    # Linear weights stored (in, out): y = x @ W + b  (== nn.Linear with W.T)
    w1 = 0.02 * jax.random.normal(k_w1, (IMG_DIM, HIDDEN), dtype=jnp.float32)
    b1 = 0.02 * jax.random.normal(k_b1, (HIDDEN,), dtype=jnp.float32)
    w2 = 0.02 * jax.random.normal(k_w2, (HIDDEN, HIDDEN), dtype=jnp.float32)
    b2 = 0.02 * jax.random.normal(k_b2, (HIDDEN,), dtype=jnp.float32)
    gamma = 1.0 + 0.1 * jax.random.normal(k_g, (HIDDEN,), dtype=jnp.float32)
    beta = 0.1 * jax.random.normal(k_bt, (HIDDEN,), dtype=jnp.float32)

    # tq=8 at this small size -> 2 grid steps, exercises the tiled path.
    out = image_embeddings(img_feat, pos_embs, type_embeddings,
                           w1, b1, w2, b2, gamma, beta, tq=8)
    out = jax.block_until_ready(out)

    ref = _reference(img_feat, pos_embs, type_embeddings,
                     w1, b1, w2, b2, gamma, beta)
    assert out.shape == (B, S, HIDDEN)
    assert jnp.allclose(out, ref, atol=1e-5, rtol=1e-5), "mismatch vs reference"

    # Also exercise the per-token type-embedding path (no bias fold).
    type_full = 0.02 * jax.random.normal(k_t, (B, S, HIDDEN), dtype=jnp.float32)
    out2 = jax.block_until_ready(
        image_embeddings(img_feat, pos_embs, type_full,
                         w1, b1, w2, b2, gamma, beta, tq=8))
    ref2 = _reference(img_feat, pos_embs, type_full, w1, b1, w2, b2, gamma, beta)
    assert jnp.allclose(out2, ref2, atol=1e-5, rtol=1e-5), "mismatch (per-token type)"

    print("KERNEL_OK")
</pallas_src>

<mosaic_0001>
module attributes {stable_mosaic.version = 11 : i64} {
  func.func @_img_embed_kernel(%arg0: i32, %arg1: memref<8x256xf32, #tpu.memory_space<vmem>>, %arg2: memref<8x128xf32, #tpu.memory_space<vmem>>, %arg3: memref<256x128xf32, #tpu.memory_space<vmem>>, %arg4: memref<1x128xf32, #tpu.memory_space<vmem>>, %arg5: memref<128x128xf32, #tpu.memory_space<vmem>>, %arg6: memref<1x128xf32, #tpu.memory_space<vmem>>, %arg7: memref<1x128xf32, #tpu.memory_space<vmem>>, %arg8: memref<1x128xf32, #tpu.memory_space<vmem>>, %arg9: memref<8x128xf32, #tpu.memory_space<vmem>>) attributes {dimension_semantics = [#tpu.dimension_semantics<parallel>], iteration_bounds = array<i64: 2>, scalar_prefetch = 0 : i64, scratch_operands = 0 : i64, tpu.core_type = #tpu.core_type<tc>, window_params = [{transform_indices = @transform_0, window_bounds = array<i64: 8, 256>}, {transform_indices = @transform_1, window_bounds = array<i64: 8, 128>}, {pipeline_mode = #tpu.pipeline_mode<synchronous>, transform_indices = @transform_2, window_bounds = array<i64: 256, 128>}, {pipeline_mode = #tpu.pipeline_mode<synchronous>, transform_indices = @transform_3, window_bounds = array<i64: 1, 128>}, {pipeline_mode = #tpu.pipeline_mode<synchronous>, transform_indices = @transform_4, window_bounds = array<i64: 128, 128>}, {pipeline_mode = #tpu.pipeline_mode<synchronous>, transform_indices = @transform_5, window_bounds = array<i64: 1, 128>}, {pipeline_mode = #tpu.pipeline_mode<synchronous>, transform_indices = @transform_6, window_bounds = array<i64: 1, 128>}, {pipeline_mode = #tpu.pipeline_mode<synchronous>, transform_indices = @transform_7, window_bounds = array<i64: 1, 128>}, {transform_indices = @transform_8, window_bounds = array<i64: 8, 128>}]} {
    %c0 = arith.constant 0 : index
    %c0_0 = arith.constant 0 : index
    %0 = vector.load %arg1[%c0, %c0_0] : memref<8x256xf32, #tpu.memory_space<vmem>>, vector<8x256xf32>
    %c0_1 = arith.constant 0 : index
    %c0_2 = arith.constant 0 : index
    %1 = vector.load %arg3[%c0_1, %c0_2] : memref<256x128xf32, #tpu.memory_space<vmem>>, vector<256x128xf32>
    %cst = arith.constant dense<0.000000e+00> : vector<8x128xf32>
    %2 = tpu.matmul %0, %1, %cst {dimension_numbers = #tpu.dot_dimension_numbers<[1], [0], [0], [1], [0, 0, 1, 1], [], []>} : vector<8x256xf32>, vector<256x128xf32>, vector<8x128xf32> -> vector<8x128xf32>
    %c0_3 = arith.constant 0 : index
    %c0_4 = arith.constant 0 : index
    %3 = vector.load %arg4[%c0_3, %c0_4] : memref<1x128xf32, #tpu.memory_space<vmem>>, vector<1x128xf32>
    %4 = vector.broadcast %3 : vector<1x128xf32> to vector<8x128xf32>
    %5 = arith.addf %2, %4 : vector<8x128xf32>
    %6 = math.tanh %5 : vector<8x128xf32>
    %c0_5 = arith.constant 0 : index
    %c0_6 = arith.constant 0 : index
    %7 = vector.load %arg5[%c0_5, %c0_6] : memref<128x128xf32, #tpu.memory_space<vmem>>, vector<128x128xf32>
    %cst_7 = arith.constant dense<0.000000e+00> : vector<8x128xf32>
    %8 = tpu.matmul %6, %7, %cst_7 {dimension_numbers = #tpu.dot_dimension_numbers<[1], [0], [0], [1], [0, 0, 1, 1], [], []>} : vector<8x128xf32>, vector<128x128xf32>, vector<8x128xf32> -> vector<8x128xf32>
    %c0_8 = arith.constant 0 : index
    %c0_9 = arith.constant 0 : index
    %9 = vector.load %arg6[%c0_8, %c0_9] : memref<1x128xf32, #tpu.memory_space<vmem>>, vector<1x128xf32>
    %10 = vector.broadcast %9 : vector<1x128xf32> to vector<8x128xf32>
    %11 = arith.addf %8, %10 : vector<8x128xf32>
    %c0_10 = arith.constant 0 : index
    %c0_11 = arith.constant 0 : index
    %12 = vector.load %arg2[%c0_10, %c0_11] : memref<8x128xf32, #tpu.memory_space<vmem>>, vector<8x128xf32>
    %13 = arith.addf %11, %12 : vector<8x128xf32>
    %cst_12 = arith.constant dense<0.000000e+00> : vector<8xf32>
    %14 = vector.multi_reduction <add>, %13, %cst_12 [1] : vector<8x128xf32> to vector<8xf32>
    %15 = vector.shape_cast %14 : vector<8xf32> to vector<8x1xf32>
    %cst_13 = arith.constant 1.280000e+02 : f32
    %16 = vector.broadcast %cst_13 : f32 to vector<8x1xf32>
    %17 = arith.divf %15, %16 : vector<8x1xf32>
    %18 = vector.broadcast %17 : vector<8x1xf32> to vector<8x128xf32>
    %19 = arith.subf %13, %18 : vector<8x128xf32>
    %20 = arith.mulf %19, %19 : vector<8x128xf32>
    %cst_14 = arith.constant dense<0.000000e+00> : vector<8xf32>
    %21 = vector.multi_reduction <add>, %20, %cst_14 [1] : vector<8x128xf32> to vector<8xf32>
    %22 = vector.shape_cast %21 : vector<8xf32> to vector<8x1xf32>
    %cst_15 = arith.constant 1.280000e+02 : f32
    %23 = vector.broadcast %cst_15 : f32 to vector<8x1xf32>
    %24 = arith.divf %22, %23 : vector<8x1xf32>
    %cst_16 = arith.constant 9.99999996E-13 : f32
    %25 = vector.broadcast %cst_16 : f32 to vector<8x1xf32>
    %26 = arith.addf %24, %25 : vector<8x1xf32>
    %27 = math.rsqrt %26 : vector<8x1xf32>
    %28 = vector.broadcast %27 : vector<8x1xf32> to vector<8x128xf32>
    %29 = arith.mulf %19, %28 : vector<8x128xf32>
    %c0_17 = arith.constant 0 : index
    %c0_18 = arith.constant 0 : index
    %30 = vector.load %arg7[%c0_17, %c0_18] : memref<1x128xf32, #tpu.memory_space<vmem>>, vector<1x128xf32>
    %31 = vector.broadcast %30 : vector<1x128xf32> to vector<8x128xf32>
    %32 = arith.mulf %29, %31 : vector<8x128xf32>
    %c0_19 = arith.constant 0 : index
    %c0_20 = arith.constant 0 : index
    %33 = vector.load %arg8[%c0_19, %c0_20] : memref<1x128xf32, #tpu.memory_space<vmem>>, vector<1x128xf32>
    %34 = vector.broadcast %33 : vector<1x128xf32> to vector<8x128xf32>
    %35 = arith.addf %32, %34 : vector<8x128xf32>
    %c0_21 = arith.constant 0 : index
    %c0_22 = arith.constant 0 : index
    %36 = vector.load %arg9[%c0_21, %c0_22] : memref<8x128xf32, #tpu.memory_space<vmem>>, vector<8x128xf32>
    tpu.vector_store %arg9[%c0_21, %c0_22], %35 {strides = array<i32>} : memref<8x128xf32, #tpu.memory_space<vmem>>, vector<8x128xf32>,
    return
  }
  func.func @transform_0(%arg0: i32) -> (i32, i32) {
    %c0_i32 = arith.constant 0 : i32
    %c0_i32_0 = arith.constant 0 : i32
    return %arg0, %c0_i32 : i32, i32
  }
  func.func @transform_1(%arg0: i32) -> (i32, i32) {
    %c0_i32 = arith.constant 0 : i32
    %c0_i32_0 = arith.constant 0 : i32
    return %arg0, %c0_i32 : i32, i32
  }
  func.func @transform_2(%arg0: i32) -> (i32, i32) {
    %c0_i32 = arith.constant 0 : i32
    %c0_i32_0 = arith.constant 0 : i32
    %c0_i32_1 = arith.constant 0 : i32
    return %c0_i32, %c0_i32_0 : i32, i32
  }
  func.func @transform_3(%arg0: i32) -> (i32, i32) {
    %c0_i32 = arith.constant 0 : i32
    %c0_i32_0 = arith.constant 0 : i32
    %c0_i32_1 = arith.constant 0 : i32
    return %c0_i32, %c0_i32_0 : i32, i32
  }
  func.func @transform_4(%arg0: i32) -> (i32, i32) {
    %c0_i32 = arith.constant 0 : i32
    %c0_i32_0 = arith.constant 0 : i32
    %c0_i32_1 = arith.constant 0 : i32
    return %c0_i32, %c0_i32_0 : i32, i32
  }
  func.func @transform_5(%arg0: i32) -> (i32, i32) {
    %c0_i32 = arith.constant 0 : i32
    %c0_i32_0 = arith.constant 0 : i32
    %c0_i32_1 = arith.constant 0 : i32
    return %c0_i32, %c0_i32_0 : i32, i32
  }
  func.func @transform_6(%arg0: i32) -> (i32, i32) {
    %c0_i32 = arith.constant 0 : i32
    %c0_i32_0 = arith.constant 0 : i32
    %c0_i32_1 = arith.constant 0 : i32
    return %c0_i32, %c0_i32_0 : i32, i32
  }
  func.func @transform_7(%arg0: i32) -> (i32, i32) {
    %c0_i32 = arith.constant 0 : i32
    %c0_i32_0 = arith.constant 0 : i32
    %c0_i32_1 = arith.constant 0 : i32
    return %c0_i32, %c0_i32_0 : i32, i32
  }
  func.func @transform_8(%arg0: i32) -> (i32, i32) {
    %c0_i32 = arith.constant 0 : i32
    %c0_i32_0 = arith.constant 0 : i32
    return %arg0, %c0_i32 : i32, i32
  }
}

</mosaic_0001>

<bundles_post_ra>
// kernel: tpu_custom_call.1
= control target key start
LH: loop header
LB: loop body
LE: loop exit
PB: predicated region body
PF: predicated region fallthrough
CT: control target
= control target key end

     0   :  { %s1241_s0 = inlined_call_operand.hbm [shape: f32[16,256], index: 0, kind: input, shape index: {}]   ;;  %s1242_s1 = inlined_call_operand.hbm [shape: f32[16,128], index: 1, kind: input, shape index: {}]   ;;  %s1243_s2 = inlined_call_operand.hbm [shape: f32[256,128], index: 2, kind: input, shape index: {}]   ;;  %s1244_s3 = inlined_call_operand.vmem [shape: f32[1,128], index: 3, kind: input, shape index: {}]   ;;  %s1245_s4 = inlined_call_operand.hbm [shape: f32[128,128], index: 4, kind: input, shape index: {}]   ;;  %s1246_s5 = inlined_call_operand.vmem [shape: f32[1,128], index: 5, kind: input, shape index: {}]   ;;  %s1247_s6 = inlined_call_operand.vmem [shape: f32[1,128], index: 6, kind: input, shape index: {}]   ;;  %s1248_s7 = inlined_call_operand.vmem [shape: f32[1,128], index: 7, kind: input, shape index: {}]   ;;  %s1249_s8 = inlined_call_operand.hbm [shape: f32[16,128], index: 8, kind: output, shape index: {}]  }
   0x1   :  { %1255 = sst [smem:[#allocation21_spill]] %s1243_s2 }
   0x2   :  { %1256 = sst [smem:[#allocation22_spill]] %s1245_s4 }
   0x3   :  { %13 = vsyncpa [#allocation3], 0 }
   0x4   :  { %15 = vsyncpa [#allocation3 + $0x1], 0 }
   0x5   :  { %16 = vsyncpa [#allocation6], 0 }
   0x6   :  { %18 = vsyncpa [#allocation6 + $0x1], 0 }
   0x7   :  { %19 = vsyncpa [#allocation9], 0 }
   0x8   :  { %20 = vsyncpa [#allocation4], 0 }
   0x9   :  { %22 = vsyncpa [#allocation4 + $0x1], 0  ;;  %s1039_s27 = smov 0   ;;  %s1041_s28 = smov 0  }
   0xa   :  { %s1043_s29 = smov 0   ;;  %s1045_s30 = smov 0  }
   0xb LB: > { %1257 = sst [smem:[#allocation16_spill]] %s975_s27  ;;  %s1063_s12 = sadd.s32 4294967295, %s987_s30   ;;  %s987_s30 = sphi %s1045_s30, %s1273_s30   ;;  %s983_s29 = sphi %s1043_s29, %s1275_s29   ;;  %s979_s28 = sphi %s1041_s28, %s1277_s28   ;;  %s975_s27 = sphi %s1039_s27, %s1276_s27  }
   0xc   : > { %1258 = sst [smem:[#allocation17_spill]] %s983_s29  ;;  %p684_p0 = scmp.ge.s32.totalorder %s987_s30, 1 }
   0xd   : > { %s1259_s2 = sld [smem:[#allocation21_spill]]  ;;  %p49_p1 = scmp.eq.s32.totalorder %s1063_s12, 0 }
   0xe   : > { %p237_p2 = scmp.lt.s32.totalorder %s987_s30, 3  ;;  %s989_s14 = smov [#allocation7]  }
   0xf   : > { %s250_s15 = sshll.u32 %s989_s14, 4  ;;  %s1261_s4 = sld [smem:[#allocation22_spill]]  ;;  %s251_s15 = int_to_ptr.vmem [resolvable:$true] %s250_s15 }
  0x10   : > { %p1068_p3 = pnand %p684_p0, %p237_p2  ;;  %s990_s19 = smov [#allocation8]  }
  0x11   : > { %s267_s20 = sshll.u32 %s990_s19, 4  ;;  %s991_s21 = smov 128   ;;  %s268_s20 = int_to_ptr.vmem [resolvable:$true] %s267_s20 }
  0x12   : > { %p718_p4 = pneg %p1068_p3  ;;  %s992_s22 = smov 8  }
  0x13   : > { %s248_s11 = sshll.u32 %s1259_s2, 4  ;;  %s683_s23 = sadd.s32 4294967294, %s987_s30   ;;  %s249_s11 = int_to_ptr.hbm [resolvable:$true] %s248_s11 }
  0x14   : > { %p719_p6 = pnand %p718_p4, %p49_p1  ;;  %s1082_s24 = sadd.s32 1, %s987_s30  }
  0x15   : > { %s265_s18 = sshll.u32 %s1261_s4, 4  ;;  %1262 = sst [smem:[#allocation18_spill]] %s1082_s24  ;;  %s266_s18 = int_to_ptr.hbm [resolvable:$true] %s265_s18 }
  0x16   : > { %721 = dma.hbm_to_vmem [thread:$0]  (!%p719_p6), %s249_s11, 4096, %s251_s15, [#allocation6], %s991_s21, %s991_s21, %s992_s22  }
  0x17   : > { %724 = dma.hbm_to_vmem [thread:$0]  (!%p719_p6), %s266_s18, 2048, %s268_s20, [#allocation9], %s991_s21, %s991_s21, %s992_s22  }
  0x18   : > { %s32_s25 = ssub.s32 %s987_s30, %s1082_s24  ;;  %s35_s26 = sadd.s32 1, %s983_s29 }
  0x19   : > { %p33_p7 = scmp.eq.s32.totalorder %s32_s25, 0  ;;  %p42_p8 = scmp.ne.s32.totalorder %s983_s29, %s979_s28 }
  0x1a   : > { %p43_p9 = scmp.eq.s32.totalorder %s987_s30, 0  ;;  %p48_p10 = scmp.ne.s32.totalorder %s979_s28, %s975_s27 }
  0x1b   : > { %s1093_s9 = scalar_select %p33_p7, %s983_s29, %s35_s26  }
  0x1c   : > { %p1095_p11 = por %p43_p9, %p42_p8  ;;  %p1101_p12 = por %p49_p1, %p48_p10 }
  0x1d   : > { %1263 = sst [smem:[#allocation19_spill]] %s1093_s9  ;;  %p224_p13 = scmp.eq.s32.totalorder %s1063_s12, 1 }
  0x1e   : > { %p230_p0 = scmp.eq.s32.totalorder %s683_s23, 1  ;;  %p738_p2 = scmp.lt.s32.totalorder %s987_s30, 2 }
  0x1f   : > { %s1108_s14 = sand.u32 1, %s983_s29   ;;  %p1110_p4 = por %p224_p13, %p42_p8 }
  0x20   : > { %p1114_p6 = por %p230_p0, %p48_p10  ;;  %s688_s17 = sshll.u32 %s1108_s14, 4 }
  0x21   : > { %s703_s18 = sshll.u32 %s987_s30, 4  ;;  %s294_s22 = scalar_lea.vmem [#allocation2], %s688_s17 }
  0x22   : > { %s1267_s16 = scalar_select %p1114_p6, 1, 0 }
  0x23   : > { %s299_s21 = scalar_lea.hbm %s1241_s0, %s703_s18  ;;  %s303_s23 = sshll.u32 %s294_s22, 4  ;;  %s304_s23 = int_to_ptr.vmem [resolvable:$true] %s303_s23 }
  0x24   : > { %1268 = sst [smem:[#allocation20_spill]] %s1267_s16  ;;  %s301_s25 = sshll.u32 %s299_s21, 4  ;;  %s302_s25 = int_to_ptr.hbm [resolvable:$true] %s301_s25 }
  0x25   : > { %p1125_p7 = pnand %p738_p2, %p1095_p11  ;;  %s310_s2 = sand.u32 1, %s987_s30  }
  0x26   : > { %s691_s4 = sshll.u32 %s1108_s14, 3  ;;  %s291_s9 = scalar_lea.sflag [#allocation3], %s1108_s14 }
  0x27   : > { %s849_s29 = sshra.s32 %s302_s25, 4  ;;  %p853_p9 = pneg %p1125_p7  ;;  %s850_s29 = int_to_ptr.hbm [resolvable:$true] %s849_s29 }
  0x28   : > { %s851_s24 = scalar_lea.hbm %s850_s29, 16  ;;  %s856_s18 = scalar_lea.hbm %s1241_s0, 32 }
  0x29   : > { %p852_p8 = scmp.ne.s32.totalorder %s850_s29, %s851_s24  ;;  %p857_p11 = scmp.lt.s32.totalorder %s850_s29, %s1241_s0 }
  0x2a   : > { %p858_p0 = scmp.lt.s32.totalorder %s856_s18, %s851_s24 }
  0x2b   : > { %p854_p10 = pnand %p853_p9, %p852_p8 }
  0x2c   : > { %p859_p2 = por %p858_p0, %p857_p11 }
  0x2d   : > { %p855_p13 = pneg %p854_p10 }
  0x2f   : > { %p860_p5 = pnand %p859_p2, %p855_p13 }
  0x31   : > { %863 = shalt.err (!%p860_p5)
}
  0x32   : > { %728 = dma.hbm_to_vmem [thread:$0]  (!%p1125_p7), %s302_s25, 256, %s304_s23, %s291_s9  }
  0x33   : > { %s692_s14 = sshll.u32 %s987_s30, 3  ;;  %s314_s10 = scalar_lea.vmem [#allocation5], %s691_s4 }
  0x34   : > { %s318_s16 = scalar_lea.hbm %s1242_s1, %s692_s14  ;;  %s322_s17 = sshll.u32 %s314_s10, 4  ;;  %s323_s17 = int_to_ptr.vmem [resolvable:$true] %s322_s17 }
  0x35   : > { %s320_s27 = sshll.u32 %s318_s16, 4  ;;  %s311_s29 = scalar_lea.sflag [#allocation6], %s310_s2  ;;  %s321_s27 = int_to_ptr.hbm [resolvable:$true] %s320_s27 }
  0x36   : > { %s879_s24 = sshra.s32 %s321_s27, 4  ;;  %s886_s25 = scalar_lea.hbm %s1242_s1, 16  ;;  %s880_s24 = int_to_ptr.hbm [resolvable:$true] %s879_s24 }
  0x37   : > { %s881_s18 = scalar_lea.hbm %s880_s24, 8  ;;  %p887_p13 = scmp.lt.s32.totalorder %s880_s24, %s1242_s1 }
  0x38   : > { %p882_p5 = scmp.ne.s32.totalorder %s880_s24, %s881_s18  ;;  %p888_p11 = scmp.lt.s32.totalorder %s886_s25, %s881_s18 }
  0x3a   : > { %p884_p8 = pnand %p882_p5, %p853_p9  ;;  %p889_p0 = por %p888_p11, %p887_p13 }
  0x3c   : > { %p885_p10 = pneg %p884_p8 }
  0x3e   : > { %p890_p2 = pnand %p889_p0, %p885_p10 }
  0x40   : > { %893 = shalt.err (!%p890_p2)
}
  0x41   : > { %731 = dma.hbm_to_vmem [thread:$0]  (!%p1125_p7), %s321_s27, 128, %s323_s17, %s311_s29  }
  0x42   : > { %331 = sbr.rel (%p1068_p3) target bundleno = 653 (0x28d), region = 52  ;;  %s1163_s2 = sand.u32 (!%p1068_p3), 1, %s979_s28  }
  0x43   : > { %s694_s4 = sshll.u32 (!%p1068_p3), %s1163_s2, 4  ;;  %s334_s16 = scalar_lea.sflag (!%p1068_p3), [#allocation3], %s1163_s2 }
  0x44   : > { %s1167_s14 = scalar_lea.vmem (!%p1068_p3), [#allocation2], %s694_s4 }
  0x47   : > { %954 = dma.done.wait (%p1101_p12), %s334_s16, 256  }
  0x48   : > { %956 = vsyncadd (%p1101_p12), %s334_s16, 4294967040  ;;  %s343_s27 = sand.u32 1, %s1063_s12   ;;  %s695_s13 = sshll.u32 %s1163_s2, 3 }
  0x49   : > { %s344_s26 = scalar_lea.sflag [#allocation6], %s343_s27  ;;  %s1177_s21 = scalar_lea.vmem [#allocation5], %s695_s13 }
  0x4a   : > { %958 = dma.done.wait (%p1101_p12), %s344_s26, 128  }
  0x4b   : > { %960 = vsyncadd (%p1101_p12), %s344_s26, 4294967168 }
  0x4c   : > { %962 = dma.done.wait (%p49_p1), [#allocation6], 4096  }
  0x4d   : > { %964 = vsyncadd (%p49_p1), [#allocation6], 4294963200 }
  0x4e   : > { %966 = dma.done.wait (%p49_p1), [#allocation9], 2048  }
  0x4f   : > { %968 = vsyncadd (%p49_p1), [#allocation9], 4294965248  ;;  %v413_v0 = vld [vmem:[#allocation7 + $0x78] sm:$0xff]  ;;  %v412_v1 = vld [vmem:[#allocation7 + $0x70] sm:$0xff]  ;;  %v993_v61 = vmov 128.0   ;;  %s700_s29 = sshll.u32 %s1063_s12, 3 }
  0x50   : > { %v429_v2 = vld [vmem:[#allocation7 + $0xf8] sm:$0xff]  ;;  %434 = vmatpush.msra.mxu0 %v413_v0  ;;  %v428_v3 = vld [vmem:[#allocation7 + $0xf0] sm:$0xff]  ;;  %v411_v4 = vld [vmem:[#allocation7 + $0x68] sm:$0xff]  ;;  %s566_s25 = scalar_lea.hbm %s1249_s8, %s700_s29  ;;  %s395_s12 = scalar_lea.vmem [#allocation10], %s695_s13 }
  0x51   : > { %454 = vmatpush.msra.mxu1 %v429_v2  ;;  %v427_v5 = vld [vmem:[#allocation7 + $0xe8] sm:$0xff]  ;;  %v410_v6 = vld [vmem:[#allocation7 + $0x60] sm:$0xff]  ;;  %v409_v8 = vld [vmem:[#allocation7 + $0x58] sm:$0xff]  ;;  %s568_s4 = sshll.u32 %s395_s12, 4  ;;  %s570_s16 = sshll.u32 %s566_s25, 4  ;;  %s569_s4 = int_to_ptr.vmem [resolvable:$true] %s568_s4  ;;  %s571_s16 = int_to_ptr.hbm [resolvable:$true] %s570_s16 }
  0x52   : > { %435 = vmatpush.msra.mxu0 %v412_v1  ;;  %v426_v7 = vld [vmem:[#allocation7 + $0xe0] sm:$0xff]  ;;  %v425_v9 = vld [vmem:[#allocation7 + $0xd8] sm:$0xff]  ;;  %v408_v10 = vld [vmem:[#allocation7 + $0x50] sm:$0xff]  ;;  %s923_s27 = sshra.s32 %s571_s16, 4  ;;  %s929_s22 = scalar_lea.hbm %s1249_s8, 16  ;;  %s924_s27 = int_to_ptr.hbm [resolvable:$true] %s923_s27 }
  0x53   : > { %455 = vmatpush.msra.mxu1 %v428_v3  ;;  %v424_v11 = vld [vmem:[#allocation7 + $0xd0] sm:$0xff]  ;;  %v407_v12 = vld [vmem:[#allocation7 + $0x48] sm:$0xff]  ;;  %v490_v14 = vld [vmem:[#allocation8 + $0x78] sm:$0xff]  ;;  %s925_s26 = scalar_lea.hbm %s924_s27, 8  ;;  %p930_p7 = scmp.lt.s32.totalorder %s924_s27, %s1249_s8 }
  0x54   : > { %436 = vmatpush.msra.mxu0 %v411_v4  ;;  %v423_v13 = vld [vmem:[#allocation7 + $0xc8] sm:$0xff]  ;;  %v489_v15 = vld [vmem:[#allocation8 + $0x70] sm:$0xff]  ;;  %v406_v16 = vld [vmem:[#allocation7 + $0x40] sm:$0xff]  ;;  %495 = vmatpush.msra.mxu2 %v490_v14  ;;  %p926_p1 = scmp.ne.s32.totalorder %s924_s27, %s925_s26  ;;  %p931_p9 = scmp.lt.s32.totalorder %s929_s22, %s925_s26 }
  0x55   : > { %456 = vmatpush.msra.mxu1 %v427_v5  ;;  %v422_v17 = vld [vmem:[#allocation7 + $0xc0] sm:$0xff]  ;;  %v488_v18 = vld [vmem:[#allocation8 + $0x68] sm:$0xff]  ;;  %v405_v19 = vld [vmem:[#allocation7 + $0x38] sm:$0xff] }
  0x56   : > { %437 = vmatpush.msra.mxu0 %v410_v6  ;;  %v421_v20 = vld [vmem:[#allocation7 + $0xb8] sm:$0xff]  ;;  %496 = vmatpush.msra.mxu2 %v489_v15  ;;  %v487_v21 = vld [vmem:[#allocation8 + $0x60] sm:$0xff]  ;;  %v404_v22 = vld [vmem:[#allocation7 + $0x30] sm:$0xff]  ;;  %p927_p3 = pnand %p926_p1, %p1110_p4  ;;  %p932_p5 = por %p931_p9, %p930_p7 }
  0x57   : > { %457 = vmatpush.msra.mxu1 %v426_v7  ;;  %v420_v23 = vld [vmem:[#allocation7 + $0xb0] sm:$0xff]  ;;  %v486_v24 = vld [vmem:[#allocation8 + $0x58] sm:$0xff]  ;;  %v403_v25 = vld [vmem:[#allocation7 + $0x28] sm:$0xff] }
  0x58   : > { %438 = vmatpush.msra.mxu0 %v409_v8  ;;  %497 = vmatpush.msra.mxu2 %v488_v18  ;;  %v419_v26 = vld [vmem:[#allocation7 + $0xa8] sm:$0xff]  ;;  %v485_v27 = vld [vmem:[#allocation8 + $0x50] sm:$0xff]  ;;  %v402_v28 = vld [vmem:[#allocation7 + $0x20] sm:$0xff]  ;;  %p928_p12 = pneg %p927_p3 }
  0x59   : > { %458 = vmatpush.msra.mxu1 %v425_v9  ;;  %v418_v29 = vld [vmem:[#allocation7 + $0xa0] sm:$0xff]  ;;  %v484_v30 = vld [vmem:[#allocation8 + $0x48] sm:$0xff]  ;;  %v401_v31 = vld [vmem:[#allocation7 + $0x18] sm:$0xff] }
  0x5a   : > { %439 = vmatpush.msra.mxu0 %v408_v10  ;;  %498 = vmatpush.msra.mxu2 %v487_v21  ;;  %v417_v32 = vld [vmem:[#allocation7 + $0x98] sm:$0xff]  ;;  %v483_v33 = vld [vmem:[#allocation8 + $0x40] sm:$0xff]  ;;  %v400_v34 = vld [vmem:[#allocation7 + $0x10] sm:$0xff]  ;;  %p933_p8 = pnand %p932_p5, %p928_p12 }
  0x5b   : > { %459 = vmatpush.msra.mxu1 %v424_v11  ;;  %v416_v35 = vld [vmem:[#allocation7 + $0x90] sm:$0xff]  ;;  %v482_v36 = vld [vmem:[#allocation8 + $0x38] sm:$0xff]  ;;  %v399_v37 = vld [vmem:[#allocation7 + $0x8] sm:$0xff] }
  0x5c   : > { %440 = vmatpush.msra.mxu0 %v407_v12  ;;  %499 = vmatpush.msra.mxu2 %v486_v24  ;;  %v415_v38 = vld [vmem:[#allocation7 + $0x88] sm:$0xff]  ;;  %v481_v39 = vld [vmem:[#allocation8 + $0x30] sm:$0xff]  ;;  %v398_v40 = vld [vmem:[#allocation7] sm:$0xff] }
  0x5d   : > { %460 = vmatpush.msra.mxu1 %v423_v13  ;;  %v414_v41 = vld [vmem:[#allocation7 + $0x80] sm:$0xff]  ;;  %v397_v43 = vld [vmem:[%s1167_s14 + $0x8] sm:$0xff]  ;;  %v477_v47 = vld [vmem:[#allocation8 + $0x10] sm:$0xff] }
  0x5e   : > { %441 = vmatpush.msra.mxu0 %v406_v16  ;;  %500 = vmatpush.msra.mxu2 %v485_v27  ;;  %v396_v42 = vld [vmem:[%s1167_s14] sm:$0xff]  ;;  %v480_v44 = vld [vmem:[#allocation8 + $0x28] sm:$0xff]  ;;  %v478_v46 = vld [vmem:[#allocation8 + $0x18] sm:$0xff]  ;;  %s556_s14 = scalar_lea.sflag [#allocation4], %s1163_s2 }
  0x5f   : > { %461 = vmatpush.msra.mxu1 %v422_v17  ;;  %v479_v45 = vld [vmem:[#allocation8 + $0x20] sm:$0xff]  ;;  %v476_v48 = vld [vmem:[#allocation8 + $0x8] sm:$0xff]  ;;  %v779_v50 = vld [vmem:[%s1244_s3] ss:$0 sm:$0xff] }
  0x60   : > { %442 = vmatpush.msra.mxu0 %v405_v19  ;;  %501 = vmatpush.msra.mxu2 %v484_v30  ;;  %v475_v49 = vld [vmem:[#allocation8] sm:$0xff]  ;;  %v780_v56 = vld [vmem:[%s1246_s5] ss:$0 sm:$0xff] }
  0x61   : > { %462 = vmatpush.msra.mxu1 %v421_v20  ;;  %v515_v58 = vld [vmem:[%s1177_s21] sm:$0xff] }
  0x62   : > { %443 = vmatpush.msra.mxu0 %v404_v22  ;;  %502 = vmatpush.msra.mxu2 %v483_v33  ;;  %v781_v17 = vld [vmem:[%s1247_s6] ss:$0 sm:$0xff] }
  0x63   : > { %463 = vmatpush.msra.mxu1 %v420_v23  ;;  %v782_v20 = vld [vmem:[%s1248_s7] ss:$0 sm:$0xff] }
  0x64   : > { %444 = vmatpush.msra.mxu0 %v403_v25  ;;  %503 = vmatpush.msra.mxu2 %v482_v36 }
  0x65   : > { %464 = vmatpush.msra.mxu1 %v419_v26 }
  0x66   : > { %445 = vmatpush.msra.mxu0 %v402_v28  ;;  %504 = vmatpush.msra.mxu2 %v481_v39 }
  0x67   : > { %465 = vmatpush.msra.mxu1 %v418_v29 }
  0x68   : > { %446 = vmatpush.msra.mxu0 %v401_v31  ;;  %505 = vmatpush.msra.mxu2 %v480_v44 }
  0x69   : > { %466 = vmatpush.msra.mxu1 %v417_v32 }
  0x6a   : > { %447 = vmatpush.msra.mxu0 %v400_v34  ;;  %506 = vmatpush.msra.mxu2 %v479_v45 }
  0x6b   : > { %467 = vmatpush.msra.mxu1 %v416_v35 }
  0x6c   : > { %448 = vmatpush.msra.mxu0 %v399_v37  ;;  %507 = vmatpush.msra.mxu2 %v478_v46 }
  0x6d   : > { %468 = vmatpush.msra.mxu1 %v415_v38 }
  0x6e   : > { %449 = vmatpush.msra.mxu0 %v398_v40  ;;  %508 = vmatpush.msra.mxu2 %v477_v47 }
  0x6f   : > { %469 = vmatpush.msra.mxu1 %v414_v41  ;;  %450 = vmatmul.f32.vlgmr.msra.gmra.mxu0 %v396_v42 }
  0x70   : > { %470 = vmatmul.f32.vlgmr.msra.gmra.mxu1 %v397_v43  ;;  %509 = vmatpush.msra.mxu2 %v476_v48 }
  0x72   : > { %510 = vmatpush.msra.mxu2 %v475_v49 }
  0xec   : > { %v451_v51 = vpop.f32.mrf.mxu0 }
  0xed   : > { %v471_v52 = vpop.f32.mrf.mxu1  ;;  %v452_v53 = vadd.f32 %v779_v50, %v451_v51 }
  0xef   : > { %v472_v54 = vadd.f32 %v471_v52, %v452_v53 }
  0xf1   : > { %783 = vtanh.f32 %v472_v54 }
  0xf2   : > { %785 = vrcp.f32 %v993_v61 }
  0xf7   : > { %v784_v55 = vpop.eup %783 }
  0xf8   : > { %511 = vmatmul.f32.vlgmr.msra.gmra.mxu2 %v784_v55  ;;  %v786_v62 = vpop.eup %785 }
  0xf9   : > { %v520_v63 = vmul.f32 128.0, %v786_v62  ;;  %vm524_vm0 = vweird.f32 %v786_v62 }
  0xfb   : > { %v521_v0 = vsub.f32 1.0, %v520_v63 }
  0xfd   : > { %v522_v1 = vmul.f32 %v786_v62, %v521_v0 }
  0xff   : > { %v523_v2 = vadd.f32 %v786_v62, %v522_v1 }
 0x101   : > { %v525_v3 = vsel %vm524_vm0, %v786_v62, %v523_v2 }
 0x17b   : > { %v512_v57 = vpop.f32.mrf.mxu2 }
 0x17c   : > { %v513_v59 = vadd.f32 %v780_v56, %v512_v57 }
 0x17e   : > { %v516_v60 = vadd.f32 %v515_v58, %v513_v59 }
 0x180   : > { %517 = vadd.xlane.f32.xlu0 %v516_v60 }
 0x1f3   : > { %v518_v4 = vpop.xlane.xlu0 %517 }
 0x1f4   : > { %v526_v5 = vmul.f32 %v525_v3, %v518_v4 }
 0x1f6   : > { %v527_v6 = vsub.f32 %v516_v60, %v526_v5 }
 0x1f8   : > { %v528_v7 = vmul.f32 %v527_v6, %v527_v6 }
 0x1fa   : > { %529 = vadd.xlane.f32.xlu0 %v528_v7 }
 0x26d   : > { %v530_v8 = vpop.xlane.xlu0 %529 }
 0x26e   : > { %v531_v9 = vmul.f32 %v530_v8, %v525_v3 }
 0x270   : > { %v532_v10 = vadd.f32 1e-12, %v531_v9 }
 0x272   : > { %787 = vrsqrt.f32 %v532_v10  ;;  %vm539_vm2 = vweird.f32 %v532_v10 }
 0x278   : > { %v788_v11 = vpop.eup %787 }
 0x279   : > { %v534_v12 = vmul.f32 %v788_v11, %v532_v10  ;;  %vm540_vm1 = vweird.f32 %v788_v11 }
 0x27a   : > { %vm541_vm3 = vmor %vm539_vm2, %vm540_vm1 }
 0x27b   : > { %v535_v13 = vmul.f32 %v788_v11, %v534_v12 }
 0x27d   : > { %v536_v14 = vmul.f32 0.5, %v535_v13 }
 0x27f   : > { %v537_v15 = vsub.f32 1.5, %v536_v14 }
 0x281   : > { %v538_v16 = vmul.f32 %v788_v11, %v537_v15 }
 0x283   : > { %v542_v18 = vsel %vm541_vm3, %v788_v11, %v538_v16 }
 0x284   : > { %v543_v19 = vmul.f32 %v542_v18, %v527_v6 }
 0x286   : > { %v548_v21 = vmul.f32 %v781_v17, %v543_v19 }
 0x288   : > { %v553_v22 = vadd.f32 %v782_v20, %v548_v21 }
 0x28a   : > { %554 = vst [vmem:[%s395_s12] sm:$0xff] %v553_v22 }
 0x28b   : > { %936 = shalt.err (!%p933_p8)
}
 0x28c   : > { %716 = dma.vmem_to_hbm [thread:$0]  (%p1110_p4), %s569_s4, 128, %s571_s16, %s556_s14  }
 0x28d PF: > { %s1270_s2 = sld [smem:[#allocation16_spill]]  ;;  %p1272_p10 = scmp.ge.s32.totalorder %s987_s30, 2 }
 0x28f   : > { %p733_p13 = pnand %p1272_p10, %p1114_p6 }
 0x291   : > { %p734_p11 = pneg %p733_p13 }
 0x293   : > { %s582_s29 = sand.u32 1, %s1270_s2  }
 0x294   : > { %s583_s24 = scalar_lea.sflag [#allocation4], %s582_s29 }
 0x295   : > { %970 = dma.done.wait (%p734_p11), %s583_s24, 128  }
 0x296   : > { %972 = vsyncadd (%p734_p11), %s583_s24, 4294967168  ;;  %s1273_s30 = sld [smem:[#allocation18_spill]]  ;;  %s1276_s27 = smov %s979_s28 }
 0x297   : > { %s1274_s18 = sld [smem:[#allocation17_spill]] }
 0x298   : > { %s1275_s29 = sld [smem:[#allocation19_spill]] }
 0x29c   : > { %p25_p0 = scmp.ge.s32.totalorder %s1273_s30, 4  }
 0x29d   : > { %s1277_s28 = smov %s1274_s18 }
 0x29e   :  { %27 = sbr.rel (!%p25_p0) target bundleno = 11 (0xb), region = 118 }
 0x2a3   :  { %589 = vsyncpa [#allocation3], 1 }
 0x2a4   :  { %591 = vsyncpa [#allocation3 + $0x1], 1 }
 0x2a5   :  { %592 = vsyncpa [#allocation6], 1 }
 0x2a6   :  { %594 = vsyncpa [#allocation6 + $0x1], 1 }
 0x2a7   :  { %595 = vsyncpa [#allocation9], 1 }
 0x2a8   :  { %596 = vsyncpa [#allocation4], 1 }
 0x2a9   :  { %598 = vsyncpa [#allocation4 + $0x1], 1 }

</bundles_post_ra>
